<compile_context>
chip_gen: v7x
topology: tpu7x:2x2x1
jax: 0.10.0
libtpu: 0.0.40
codegen_flags: <defaults>
</compile_context>

<pallas_src>
import jax
import jax.numpy as jnp
from jax import lax
from jax.experimental import pallas as pl
from jax.experimental.pallas import tpu as pltpu

LANE = 128  # TPU lane width — keep intermediate feature dims lane-dense.


def _round_up(n, m):
    return ((n + m - 1) // m) * m


def syn_sigmoid_kernel(x_ref, w1_ref, w2_ref, w3_ref, o_ref):
    """One batch tile. Weights are (out_features, in_features); contraction is on
    their last dim (trans_b), so no transposes are needed anywhere."""
    dn = (((1,), (1,)), ((), ()))  # contract x's last dim with w's last dim

    def sig(v):
        # sigmoid(v) == 0.5*tanh(0.5*v) + 0.5  -> 1 EUP op instead of exp + reciprocal.
        return 0.5 * jnp.tanh(0.5 * v) + 0.5

    x = x_ref[...]
    h1 = sig(lax.dot_general(x, w1_ref[...], dn, preferred_element_type=jnp.float32))
    h2 = sig(lax.dot_general(h1, w2_ref[...], dn, preferred_element_type=jnp.float32))
    # Final layer is unpadded in its out-features dim -> direct (tb, out_features) store.
    o_ref[...] = lax.dot_general(
        h2, w3_ref[...], dn, preferred_element_type=jnp.float32
    ).astype(o_ref.dtype)


def pad_weights(w1, w2, w3):
    """One-time weight prep (call once, outside the per-step hot path).

    Pads layer-1 / layer-2 out-features to a multiple of 128 lanes and zero-pads the
    matching in-features columns of the next layer, so padded sigmoid columns (=0.5)
    contribute exactly zero downstream.  The final layer's out-features dim is left
    unpadded so the kernel can store the real output shape directly.
    """
    f1, f2 = w1.shape[0], w2.shape[0]
    f1p, f2p = _round_up(f1, LANE), _round_up(f2, LANE)
    w1p = jnp.pad(w1, ((0, f1p - f1), (0, 0)))          # (f1p, in)
    w2p = jnp.pad(w2, ((0, f2p - f2), (0, f1p - f1)))   # (f2p, f1p), zero cols kill padded h1
    w3p = jnp.pad(w3, ((0, 0), (0, f2p - f2)))          # (f3,  f2p), zero cols kill padded h2
    return w1p, w2p, w3p


def syn_sigmoid_forward(x, w1p, w2p, w3p, block_batch=4096):
    """x: (B, input_size) f32; w*p: padded PyTorch-layout weights from pad_weights()."""
    B, in_features = x.shape
    f1p = w1p.shape[0]
    f2p, f1p_chk = w2p.shape
    f3, f2p_chk = w3p.shape
    assert f1p_chk == f1p and f2p_chk == f2p

    if B >= 512:
        # Ensure the parallel batch axis has >= 2 grid steps so both v7x TensorCores
        # get tiles (v5e/v6e are single-TC; two big tiles cost them ~nothing).
        tb = min(block_batch, _round_up(pl.cdiv(B, 2), 8))
    else:
        tb = min(block_batch, B)
    grid = (pl.cdiv(B, tb),)

    flops = 2 * B * (in_features * f1p + f1p * f2p + f2p * f3)
    transcendentals = B * (f1p + f2p)
    bytes_accessed = 4 * (
        B * in_features + f1p * in_features + f2p * f1p + f3 * f2p + B * f3
    )

    return pl.pallas_call(
        syn_sigmoid_kernel,
        out_shape=jax.ShapeDtypeStruct((B, f3), x.dtype),
        grid=grid,
        in_specs=[
            pl.BlockSpec((tb, in_features), lambda i: (i, 0)),   # x: tiled over batch
            pl.BlockSpec((f1p, in_features), lambda i: (0, 0)),  # weights: full, VMEM-resident
            pl.BlockSpec((f2p, f1p), lambda i: (0, 0)),
            pl.BlockSpec((f3, f2p), lambda i: (0, 0)),
        ],
        out_specs=pl.BlockSpec((tb, f3), lambda i: (i, 0)),      # unpadded direct store
        compiler_params=pltpu.CompilerParams(
            dimension_semantics=("parallel",),  # batch tiles are independent (megacore / v7x)
        ),
        cost_estimate=pl.CostEstimate(
            flops=flops,
            transcendentals=transcendentals,
            bytes_accessed=bytes_accessed,
        ),
    )(x, w1p, w2p, w3p)


def init_linear_weight(key, out_features, in_features, dtype=jnp.float32):
    # Matches PyTorch nn.Linear default init: U(-1/sqrt(fan_in), +1/sqrt(fan_in)).
    bound = 1.0 / (in_features ** 0.5)
    return jax.random.uniform(
        key, (out_features, in_features), dtype=dtype, minval=-bound, maxval=bound
    )


if __name__ == "__main__":
    # Small shapes consistent with the module: input_size=32, layers 64/32/16, batch=8.
    batch = 8
    input_size = 32
    first_layer = 64
    second_layer = 32
    third_layer = 16

    key = jax.random.PRNGKey(0)
    kx, k1, k2, k3 = jax.random.split(key, 4)

    x = jax.random.normal(kx, (batch, input_size), dtype=jnp.float32)
    w1 = init_linear_weight(k1, first_layer, input_size)
    w2 = init_linear_weight(k2, second_layer, first_layer)
    w3 = init_linear_weight(k3, third_layer, second_layer)

    # One-time weight preparation (outside the hot path).
    w1p, w2p, w3p = pad_weights(w1, w2, w3)

    out = syn_sigmoid_forward(x, w1p, w2p, w3p)
    out = jax.block_until_ready(out)

    # Pure-JAX reference check (same semantics as the PyTorch forward).
    ref = jnp.dot(
        jax.nn.sigmoid(jnp.dot(jax.nn.sigmoid(jnp.dot(x, w1.T)), w2.T)), w3.T
    )
    assert out.shape == (batch, third_layer)
    assert jnp.allclose(out, ref, atol=1e-5, rtol=1e-5)

    print("KERNEL_OK")
</pallas_src>

<mosaic_0001>
module attributes {stable_mosaic.version = 11 : i64} {
  func.func @syn_sigmoid_kernel(%arg0: i32, %arg1: memref<8x32xf32, #tpu.memory_space<vmem>>, %arg2: memref<128x32xf32, #tpu.memory_space<vmem>>, %arg3: memref<128x128xf32, #tpu.memory_space<vmem>>, %arg4: memref<16x128xf32, #tpu.memory_space<vmem>>, %arg5: memref<8x16xf32, #tpu.memory_space<vmem>>) attributes {dimension_semantics = [#tpu.dimension_semantics<parallel>], iteration_bounds = array<i64: 1>, scalar_prefetch = 0 : i64, scratch_operands = 0 : i64, tpu.core_type = #tpu.core_type<tc>, window_params = [{transform_indices = @transform_0, window_bounds = array<i64: 8, 32>}, {pipeline_mode = #tpu.pipeline_mode<synchronous>, transform_indices = @transform_1, window_bounds = array<i64: 128, 32>}, {pipeline_mode = #tpu.pipeline_mode<synchronous>, transform_indices = @transform_2, window_bounds = array<i64: 128, 128>}, {pipeline_mode = #tpu.pipeline_mode<synchronous>, transform_indices = @transform_3, window_bounds = array<i64: 16, 128>}, {transform_indices = @transform_4, window_bounds = array<i64: 8, 16>}]} {
    %c0 = arith.constant 0 : index
    %c0_0 = arith.constant 0 : index
    %0 = vector.load %arg1[%c0, %c0_0] : memref<8x32xf32, #tpu.memory_space<vmem>>, vector<8x32xf32>
    %c0_1 = arith.constant 0 : index
    %c0_2 = arith.constant 0 : index
    %1 = vector.load %arg2[%c0_1, %c0_2] : memref<128x32xf32, #tpu.memory_space<vmem>>, vector<128x32xf32>
    %cst = arith.constant dense<0.000000e+00> : vector<8x128xf32>
    %2 = tpu.matmul %0, %1, %cst {dimension_numbers = #tpu.dot_dimension_numbers<[1], [1], [0], [0], [0, 0, 1, 0], [], []>} : vector<8x32xf32>, vector<128x32xf32>, vector<8x128xf32> -> vector<8x128xf32>
    %cst_3 = arith.constant 5.000000e-01 : f32
    %3 = vector.broadcast %cst_3 : f32 to vector<8x128xf32>
    %4 = arith.mulf %3, %2 : vector<8x128xf32>
    %5 = math.tanh %4 : vector<8x128xf32>
    %cst_4 = arith.constant 5.000000e-01 : f32
    %6 = vector.broadcast %cst_4 : f32 to vector<8x128xf32>
    %7 = arith.mulf %6, %5 : vector<8x128xf32>
    %cst_5 = arith.constant 5.000000e-01 : f32
    %8 = vector.broadcast %cst_5 : f32 to vector<8x128xf32>
    %9 = arith.addf %7, %8 : vector<8x128xf32>
    %c0_6 = arith.constant 0 : index
    %c0_7 = arith.constant 0 : index
    %10 = vector.load %arg3[%c0_6, %c0_7] : memref<128x128xf32, #tpu.memory_space<vmem>>, vector<128x128xf32>
    %cst_8 = arith.constant dense<0.000000e+00> : vector<8x128xf32>
    %11 = tpu.matmul %9, %10, %cst_8 {dimension_numbers = #tpu.dot_dimension_numbers<[1], [1], [0], [0], [0, 0, 1, 0], [], []>} : vector<8x128xf32>, vector<128x128xf32>, vector<8x128xf32> -> vector<8x128xf32>
    %cst_9 = arith.constant 5.000000e-01 : f32
    %12 = vector.broadcast %cst_9 : f32 to vector<8x128xf32>
    %13 = arith.mulf %12, %11 : vector<8x128xf32>
    %14 = math.tanh %13 : vector<8x128xf32>
    %cst_10 = arith.constant 5.000000e-01 : f32
    %15 = vector.broadcast %cst_10 : f32 to vector<8x128xf32>
    %16 = arith.mulf %15, %14 : vector<8x128xf32>
    %cst_11 = arith.constant 5.000000e-01 : f32
    %17 = vector.broadcast %cst_11 : f32 to vector<8x128xf32>
    %18 = arith.addf %16, %17 : vector<8x128xf32>
    %c0_12 = arith.constant 0 : index
    %c0_13 = arith.constant 0 : index
    %19 = vector.load %arg4[%c0_12, %c0_13] : memref<16x128xf32, #tpu.memory_space<vmem>>, vector<16x128xf32>
    %cst_14 = arith.constant dense<0.000000e+00> : vector<8x16xf32>
    %20 = tpu.matmul %18, %19, %cst_14 {dimension_numbers = #tpu.dot_dimension_numbers<[1], [1], [0], [0], [0, 0, 1, 0], [], []>} : vector<8x128xf32>, vector<16x128xf32>, vector<8x16xf32> -> vector<8x16xf32>
    %c0_15 = arith.constant 0 : index
    %c0_16 = arith.constant 0 : index
    %21 = vector.load %arg5[%c0_15, %c0_16] : memref<8x16xf32, #tpu.memory_space<vmem>>, vector<8x16xf32>
    tpu.vector_store %arg5[%c0_15, %c0_16], %20 {strides = array<i32>} : memref<8x16xf32, #tpu.memory_space<vmem>>, vector<8x16xf32>,
    return
  }
  func.func @transform_0(%arg0: i32) -> (i32, i32) {
    %c0_i32 = arith.constant 0 : i32
    %c0_i32_0 = arith.constant 0 : i32
    return %arg0, %c0_i32 : i32, i32
  }
  func.func @transform_1(%arg0: i32) -> (i32, i32) {
    %c0_i32 = arith.constant 0 : i32
    %c0_i32_0 = arith.constant 0 : i32
    %c0_i32_1 = arith.constant 0 : i32
    return %c0_i32, %c0_i32_0 : i32, i32
  }
  func.func @transform_2(%arg0: i32) -> (i32, i32) {
    %c0_i32 = arith.constant 0 : i32
    %c0_i32_0 = arith.constant 0 : i32
    %c0_i32_1 = arith.constant 0 : i32
    return %c0_i32, %c0_i32_0 : i32, i32
  }
  func.func @transform_3(%arg0: i32) -> (i32, i32) {
    %c0_i32 = arith.constant 0 : i32
    %c0_i32_0 = arith.constant 0 : i32
    %c0_i32_1 = arith.constant 0 : i32
    return %c0_i32, %c0_i32_0 : i32, i32
  }
  func.func @transform_4(%arg0: i32) -> (i32, i32) {
    %c0_i32 = arith.constant 0 : i32
    %c0_i32_0 = arith.constant 0 : i32
    return %arg0, %c0_i32 : i32, i32
  }
}

</mosaic_0001>

<bundles_post_ra>
// kernel: tpu_custom_call.1
= control target key start
LH: loop header
LB: loop body
LE: loop exit
PB: predicated region body
PF: predicated region fallthrough
CT: control target
= control target key end

     0   :  { %vm35_vm0 = vcmask 261120   ;;  %v561_v2 = vmov 0.0|0.0   ;;  %vm562_vm2 = vmmov 0   ;;  %v563_v5 = vmov 0.0   ;;  %s753_s0 = inlined_call_operand.vmem [shape: f32[8,32], index: 0, kind: input, shape index: {}]   ;;  %s754_s1 = inlined_call_operand.vmem [shape: f32[128,32], index: 1, kind: input, shape index: {}]   ;;  %s755_s2 = inlined_call_operand.vmem [shape: f32[128,128], index: 2, kind: input, shape index: {}]   ;;  %s756_s3 = inlined_call_operand.vmem [shape: f32[16,128], index: 3, kind: input, shape index: {}]   ;;  %s757_s4 = inlined_call_operand.hbm [shape: f32[8,16], index: 4, kind: output, shape index: {}]  }
   0x1   :  { %v19_v0 = vld [vmem:[%s754_s1] sm:$0xff]  ;;  %v20_v1 = vld [vmem:[%s754_s1 + $0x8] sm:$0xff]  ;;  %470 = vmatprep.subr.bf16.mxu0 %v561_v2  ;;  %vm599_vm1 = vmpackc.low %vm35_vm0, %vm35_vm0  ;;  %502 = vmatprep.subr.bf16.mxu1 %v561_v2 }
   0x2   :  { %v471_v3 = vpack.c.bf16 %v20_v1, %v19_v0  ;;  %425 = vmatprep.mubr.msk.f32.mxu0 %vm562_vm2, %v563_v5  ;;  %460 = vmatprep.mubr.msk.f32.mxu1 %vm562_vm2, %v563_v5  ;;  %v21_v6 = vld [vmem:[%s754_s1 + $0x10] sm:$0xff]  ;;  %v22_v7 = vld [vmem:[%s754_s1 + $0x18] sm:$0xff]  ;;  %v161_v8 = vld [vmem:[%s755_s2] sm:$0xff] }
   0x3   :  { %v162_v9 = vld [vmem:[%s755_s2 + $0x8] sm:$0xff]  ;;  %v475_v10 = vpack.c.bf16 %v22_v7, %v21_v6  ;;  %v163_v12 = vld [vmem:[%s755_s2 + $0x10] sm:$0xff]  ;;  %v164_v13 = vld [vmem:[%s755_s2 + $0x18] sm:$0xff] }
   0x4   :  { %473 = vmatpush3.bf16.xpose.msk.msra.mxu0 %vm599_vm1, %v471_v3  ;;  %v503_v11 = vpack.c.bf16 %v162_v9, %v161_v8 }
   0x5   :  { %474 = vmatprep.subr.bf16.mxu0 %v561_v2 }
   0x6   :  { %504 = vmatpush3.bf16.xpose.msra.mxu1 %v503_v11 }
   0x7   :  { %505 = vmatprep.subr.bf16.mxu1 %v561_v2 }
   0x8   :  { %9 = vsyncpa [#allocation3], 0  ;;  %v23_v14 = vld [vmem:[%s754_s1 + $0x20] sm:$0xff]  ;;  %v24_v15 = vld [vmem:[%s754_s1 + $0x28] sm:$0xff]  ;;  %v506_v16 = vpack.c.bf16 %v164_v13, %v163_v12  ;;  %vm323_vm3 = vcmask 130048  }
   0x9   :  { %v479_v17 = vpack.c.bf16 %v24_v15, %v23_v14  ;;  %v165_v18 = vld [vmem:[%s755_s2 + $0x20] sm:$0xff]  ;;  %v166_v19 = vld [vmem:[%s755_s2 + $0x28] sm:$0xff]  ;;  %v25_v20 = vld [vmem:[%s754_s1 + $0x30] sm:$0xff] }
   0xa   :  { %v26_v21 = vld [vmem:[%s754_s1 + $0x38] sm:$0xff]  ;;  %v509_v22 = vpack.c.bf16 %v166_v19, %v165_v18  ;;  %v167_v24 = vld [vmem:[%s755_s2 + $0x30] sm:$0xff]  ;;  %v27_v26 = vld [vmem:[%s754_s1 + $0x40] sm:$0xff] }
   0xb   :  { %v483_v23 = vpack.c.bf16 %v26_v21, %v25_v20  ;;  %v168_v25 = vld [vmem:[%s755_s2 + $0x38] sm:$0xff]  ;;  %v28_v27 = vld [vmem:[%s754_s1 + $0x48] sm:$0xff]  ;;  %v169_v30 = vld [vmem:[%s755_s2 + $0x40] sm:$0xff] }
   0xc   :  { %477 = vmatpush3.bf16.xpose.msk.msra.mxu0 %vm599_vm1, %v475_v10  ;;  %v512_v28 = vpack.c.bf16 %v168_v25, %v167_v24  ;;  %v487_v29 = vpack.c.bf16 %v28_v27, %v27_v26  ;;  %v170_v31 = vld [vmem:[%s755_s2 + $0x48] sm:$0xff]  ;;  %v29_v32 = vld [vmem:[%s754_s1 + $0x50] sm:$0xff]  ;;  %v30_v33 = vld [vmem:[%s754_s1 + $0x58] sm:$0xff] }
   0xd   :  { %478 = vmatprep.subr.bf16.mxu0 %v561_v2  ;;  %v515_v34 = vpack.c.bf16 %v170_v31, %v169_v30  ;;  %v491_v35 = vpack.c.bf16 %v30_v33, %v29_v32  ;;  %v171_v36 = vld [vmem:[%s755_s2 + $0x50] sm:$0xff]  ;;  %v172_v37 = vld [vmem:[%s755_s2 + $0x58] sm:$0xff]  ;;  %v31_v38 = vld [vmem:[%s754_s1 + $0x60] sm:$0xff] }
   0xe   :  { %507 = vmatpush3.bf16.xpose.msra.mxu1 %v506_v16  ;;  %v32_v39 = vld [vmem:[%s754_s1 + $0x68] sm:$0xff]  ;;  %v518_v40 = vpack.c.bf16 %v172_v37, %v171_v36  ;;  %v33_v42 = vld [vmem:[%s754_s1 + $0x70] sm:$0xff]  ;;  %v34_v43 = vld [vmem:[%s754_s1 + $0x78] sm:$0xff] }
   0xf   :  { %508 = vmatprep.subr.bf16.mxu1 %v561_v2  ;;  %v495_v41 = vpack.c.bf16 %v32_v39, %v31_v38  ;;  %v499_v44 = vpack.c.bf16 %v34_v43, %v33_v42  ;;  %v18_v45 = vld [vmem:[%s753_s0] sm:$0xff]  ;;  %v174_v47 = vld [vmem:[%s755_s2 + $0x68] sm:$0xff]  ;;  %v175_v49 = vld [vmem:[%s755_s2 + $0x70] sm:$0xff] }
  0x10   :  { %v173_v46 = vld [vmem:[%s755_s2 + $0x60] sm:$0xff]  ;;  %v176_v50 = vld [vmem:[%s755_s2 + $0x78] sm:$0xff]  ;;  %v252_v59 = vld [vmem:[%s756_s3 + $0x8] sm:$0xff]  ;;  %s564_s2 = smov [#allocation2]  }
  0x11   :  { %v521_v48 = vpack.c.bf16 %v174_v47, %v173_v46  ;;  %v524_v51 = vpack.c.bf16 %v176_v50, %v175_v49  ;;  %v251_v58 = vld [vmem:[%s756_s3] sm:$0xff]  ;;  %s331_s5 = sshll.u32 %s564_s2, 4  ;;  %s332_s5 = int_to_ptr.vmem [resolvable:$true] %s331_s5 }
  0x12   :  { %v527_v60 = vpack.c.bf16 %v252_v59, %v251_v58  ;;  %s537_s6 = scalar_lea.vmem %s332_s5, 128  ;;  %p542_p1 = scmp.lt.s32.totalorder %s332_s5, %s332_s5 }
  0x13   :  { %p538_p0 = scmp.ne.s32.totalorder %s332_s5, %s537_s6  ;;  %p543_p2 = scmp.lt.s32.totalorder %s537_s6, %s537_s6 }
  0x14   :  { %481 = vmatpush3.bf16.xpose.msk.msra.mxu0 %vm599_vm1, %v479_v17 }
  0x15   :  { %482 = vmatprep.subr.bf16.mxu0 %v561_v2  ;;  %p544_p3 = por %p543_p2, %p542_p1 }
  0x16   :  { %510 = vmatpush3.bf16.xpose.msra.mxu1 %v509_v22 }
  0x17   :  { %511 = vmatprep.subr.bf16.mxu1 %v561_v2  ;;  %p545_p4 = pnand %p544_p3, %p538_p0 }
  0x1c   :  { %485 = vmatpush3.bf16.xpose.msk.msra.mxu0 %vm599_vm1, %v483_v23 }
  0x1d   :  { %486 = vmatprep.subr.bf16.mxu0 %v561_v2 }
  0x1e   :  { %513 = vmatpush3.bf16.xpose.msra.mxu1 %v512_v28 }
  0x1f   :  { %514 = vmatprep.subr.bf16.mxu1 %v561_v2 }
  0x24   :  { %489 = vmatpush3.bf16.xpose.msk.msra.mxu0 %vm599_vm1, %v487_v29 }
  0x25   :  { %490 = vmatprep.subr.bf16.mxu0 %v561_v2 }
  0x26   :  { %516 = vmatpush3.bf16.xpose.msra.mxu1 %v515_v34 }
  0x27   :  { %517 = vmatprep.subr.bf16.mxu1 %v561_v2 }
  0x2c   :  { %493 = vmatpush3.bf16.xpose.msk.msra.mxu0 %vm599_vm1, %v491_v35 }
  0x2d   :  { %494 = vmatprep.subr.bf16.mxu0 %v561_v2 }
  0x2e   :  { %519 = vmatpush3.bf16.xpose.msra.mxu1 %v518_v40 }
  0x2f   :  { %520 = vmatprep.subr.bf16.mxu1 %v561_v2 }
  0x34   :  { %497 = vmatpush3.bf16.xpose.msk.msra.mxu0 %vm599_vm1, %v495_v41 }
  0x35   :  { %498 = vmatprep.subr.bf16.mxu0 %v561_v2 }
  0x36   :  { %522 = vmatpush3.bf16.xpose.msra.mxu1 %v521_v48 }
  0x37   :  { %523 = vmatprep.subr.bf16.mxu1 %v561_v2 }
  0x3c   :  { %501 = vmatpush3.bf16.xpose.msk.msra.mxu0 %vm599_vm1, %v499_v44 }
  0x3d   :  { %526 = vmatprep.subr.bf16.mxu0 %v561_v2 }
  0x3e   :  { %525 = vmatpush3.bf16.xpose.msra.mxu1 %v524_v51 }
  0x43   :  { %426 = vmatmul.mubr.msk.f32.vlgmr.msra.gmra.mrb[0].mxu0 %vm35_vm0, %v18_v45 }
  0x44   :  { %467 = vmatprep.mubr.msk.f32.mxu0 %vm562_vm2, %v563_v5  ;;  %528 = vmatpush3.bf16.xpose.msra.mxu0 %v527_v60 }
 0x116   :  { %v153_v52 = vpop.f32.mrb[0].mxu0 }
 0x117   :  { %v157_v53 = vmul.f32 0.5, %v153_v52  ;;  %v427_v54 = vpop.f32.mrb[1].mxu0 }
 0x119   :  { %533 = vtanh.f32 %v157_v53 }
 0x123   :  { %v534_v55 = vpop.eup %533 }
 0x124   :  { %v159_v56 = vmul.f32 0.5, %v534_v55 }
 0x126   :  { %v160_v57 = vadd.f32 0.5, %v159_v56 }
 0x128   :  { %461 = vmatmul.mubr.f32.vlgmr.msra.gmra.mrb[0].mxu1 %v160_v57 }
 0x1fb   :  { %v243_v61 = vpop.f32.mrb[0].mxu1 }
 0x1fc   :  { %v247_v62 = vmul.f32 0.5, %v243_v61  ;;  %v462_v63 = vpop.f32.mrb[1].mxu1 }
 0x1fe   :  { %535 = vtanh.f32 %v247_v62 }
 0x208   :  { %v536_v0 = vpop.eup %535 }
 0x209   :  { %v249_v1 = vmul.f32 0.5, %v536_v0 }
 0x20b   :  { %v250_v2 = vadd.f32 0.5, %v249_v1 }
 0x20d   :  { %468 = vmatmul.mubr.f32.vlgmr.msra.gmra.mrb[2].mxu0 %v250_v2 }
 0x2e0   :  { %v319_v3 = vpop.f32.mrb[2].mxu0 }
 0x2e1   :  { %324 = vst.msk [vmem:[#allocation2] sm:$0xff] %vm323_vm3, %v319_v3  ;;  %v469_v4 = vpop.f32.mrb[3].mxu0 }
 0x2e2   :  { %548 = shalt.err (!%p545_p4)
}
 0x2e3   :  { %s549_s8 = scalar_lea.hbm %s757_s4, 128 }
 0x2e4   :  { %p550_p5 = scmp.ne.s32.totalorder %s757_s4, %s549_s8  ;;  %p553_p6 = scmp.lt.u32.totalorder %s549_s8, %s757_s4 }
 0x2e6   :  { %p555_p7 = pnand %p553_p6, %p550_p5 }
 0x2e8   :  { %558 = shalt.err (!%p555_p7)
}
 0x2e9   :  { %334 = dma.vmem_to_hbm [thread:$0]  %s332_s5, 128, %s757_s4, [#allocation3]  }
 0x2ea   :  { %559 = dma.done.wait [#allocation3], 128  }
 0x2eb   :  { %560 = vsyncadd [#allocation3], 4294967168 }
 0x2ec   :  { %338 = vsyncpa [#allocation3], 1 }

</bundles_post_ra>
